<compile_context>
chip_gen: v7x
topology: tpu7x:2x2x1
jax: 0.10.0
libtpu: 0.0.40
codegen_flags: <defaults>
</compile_context>

<pallas_src>
import functools

import jax
import jax.numpy as jnp
from jax.experimental import pallas as pl
from jax.experimental.pallas import tpu as pltpu


# ----------------------------------------------------------------------------
# Pallas kernel (channel-major, fully fused):
#   x_ref   : [C_in, tile_n]       (bf16)  per-point features, points on lanes
#   w_ref   : [rows_pad, C_in]     (bf16)  [W_backbone ; W_lin@W_bb ; W_pt@W_bb ; 0-pad]
#   b_ref   : [rows_pad, 1]        (f32)
#   out_ref : [rows_pad, tile_n]   (bf16)  rows 0:feat_c = feat,
#                                          feat_c:feat_c+nc = seg_logit,
#                                          feat_c+nc:feat_c+2nc = seg_logit_point
# ----------------------------------------------------------------------------
def _net3dseg_kernel(x_ref, w_ref, b_ref, out_ref):
    acc = jnp.dot(w_ref[...], x_ref[...], preferred_element_type=jnp.float32)
    out_ref[...] = (acc + b_ref[...]).astype(out_ref.dtype)


def _round_up(a, b):
    return ((a + b - 1) // b) * b


def net3dseg_forward(x, params, *, tile_n=16384, compute_dtype=jnp.bfloat16):
    """x: [N, C_in] per-point features.  Returns (preds, out_3D_feature, out_aux)."""
    n, c_in = x.shape
    feat_c, c_in_w = params["w_backbone"].shape
    assert c_in_w == c_in
    num_classes = params["w_linear"].shape[0]
    nc2 = 2 * num_classes

    # ---- pre-compose (f32): backbone + both heads into ONE weight slab ------
    w_heads = jnp.concatenate([params["w_linear"], params["w_point"]], axis=0)   # [2nc, feat_c]
    b_heads = jnp.concatenate([params["b_linear"], params["b_point"]], axis=0)   # [2nc]
    w_comb = w_heads @ params["w_backbone"]                                      # [2nc, c_in]
    b_comb = w_heads @ params["b_backbone"] + b_heads                            # [2nc]

    rows = feat_c + nc2
    rows_pad = _round_up(rows, 8)                      # unmasked sublane stores
    w_all = jnp.concatenate([params["w_backbone"], w_comb], axis=0)
    b_all = jnp.concatenate([params["b_backbone"], b_comb], axis=0)
    if rows_pad != rows:
        w_all = jnp.pad(w_all, ((0, rows_pad - rows), (0, 0)))
        b_all = jnp.pad(b_all, ((0, rows_pad - rows),))
    w_all = w_all.astype(compute_dtype)                # [rows_pad, c_in]
    b_all = b_all.astype(jnp.float32)[:, None]         # [rows_pad, 1]

    # ---- channel-major input (points on the lane axis), cast before T -------
    x_cm = jnp.asarray(x, compute_dtype).T             # [c_in, n]

    # ---- tile sizing: big tiles; even-step split only if tile stays >= 8192 -
    tile_n = max(_round_up(tile_n, 128), 128)
    n128 = _round_up(n, 128)
    tile = min(tile_n, n128)
    half = _round_up(pl.cdiv(n128, 2), 128)
    if half >= 8192:                                   # v7x megacore: >=2 steps
        tile = min(tile, half)                         # never below 8192 points
    tile = max(tile, 128)

    n_pad = _round_up(n, tile)
    if n_pad != n:
        x_cm = jnp.pad(x_cm, ((0, 0), (0, n_pad - n)))
    grid = (n_pad // tile,)

    cols = lambda i: (0, i)                            # tiled over points (lanes)
    full = lambda i: (0, 0)                            # replicated weights/bias

    itemsize = jnp.dtype(compute_dtype).itemsize
    flops = 2 * n_pad * c_in * rows_pad
    bytes_accessed = (n_pad * c_in * itemsize                   # x
                      + w_all.size * itemsize + b_all.size * 4  # weights / bias
                      + n_pad * rows_pad * itemsize)            # bf16 output

    # VMEM: double-buffered x + out tiles (+weights), with headroom; cap 48 MiB
    # so v7x (64 MiB physical per TC) keeps compiler scratch headroom.
    step_bytes = (c_in + rows_pad) * tile * itemsize + w_all.size * itemsize + b_all.size * 4
    vmem_limit = int(min(max(3 * step_bytes + (4 << 20), 16 << 20), 48 << 20))

    out_cm = pl.pallas_call(
        _net3dseg_kernel,
        out_shape=jax.ShapeDtypeStruct((rows_pad, n_pad), compute_dtype),
        grid_spec=pl.GridSpec(
            grid=grid,
            in_specs=[
                pl.BlockSpec((c_in, tile), cols),      # x (channel-major)
                pl.BlockSpec((rows_pad, c_in), full),  # fused weight slab
                pl.BlockSpec((rows_pad, 1), full),     # fused bias slab
            ],
            out_specs=pl.BlockSpec((rows_pad, tile), cols),
        ),
        compiler_params=pltpu.CompilerParams(
            dimension_semantics=("parallel",),
            vmem_limit_bytes=vmem_limit),
        cost_estimate=pl.CostEstimate(flops=flops, transcendentals=0,
                                      bytes_accessed=bytes_accessed),
    )(x_cm, w_all, b_all)

    # ---- single bf16 slice+transpose back to point-major [N, rows] ----------
    # NOTE: padded columns (n..n_pad) hold bias-only garbage and are sliced off
    # here; never reduce over the channel-major output before this slice.
    out_pm = out_cm[:, :n].T                           # [N, rows_pad] (bf16)
    feat = out_pm[:, :feat_c]                          # out_3D_feature
    seg = out_pm[:, feat_c:feat_c + num_classes]       # seg_logit
    seg_pt = out_pm[:, feat_c + num_classes:feat_c + nc2]  # seg_logit_point

    preds = {"seg_logit": seg}
    out_aux = {"feats": feat, "seg_logit_point": seg_pt}
    return preds, feat, out_aux


# ----------------------------------------------------------------------------
# Deterministic parameter init (PyTorch nn.Linear layout: W[out, in]).
# ----------------------------------------------------------------------------
def init_params(key, c_in, feat_c, num_classes):
    ks = jax.random.split(key, 6)

    def linear_init(kw, kb, fan_in, fan_out):
        bound = 1.0 / jnp.sqrt(jnp.float32(fan_in))
        w = jax.random.uniform(kw, (fan_out, fan_in), jnp.float32, -bound, bound)
        b = jax.random.uniform(kb, (fan_out,), jnp.float32, -bound, bound)
        return w, b

    w_bb, b_bb = linear_init(ks[0], ks[1], c_in, feat_c)           # backbone stand-in
    w_lin, b_lin = linear_init(ks[2], ks[3], feat_c, num_classes)  # self.linear
    w_pt, b_pt = linear_init(ks[4], ks[5], feat_c, num_classes)    # aux.linear_point
    return {
        "w_backbone": w_bb, "b_backbone": b_bb,
        "w_linear": w_lin, "b_linear": b_lin,
        "w_point": w_pt, "b_point": b_pt,
    }


# ----------------------------------------------------------------------------
# Reference (pure JAX, f32) for a sanity check.
# ----------------------------------------------------------------------------
def reference_forward(x, p):
    feat = x @ p["w_backbone"].T + p["b_backbone"]
    seg = feat @ p["w_linear"].T + p["b_linear"]
    seg_pt = feat @ p["w_point"].T + p["b_point"]
    return seg, feat, seg_pt


if __name__ == "__main__":
    # Arbitrary N (not a multiple of 128) to exercise padding.
    N, C_IN, FEAT_C, NUM_CLASSES = 300, 4, 16, 6

    key = jax.random.PRNGKey(0)
    k_x, k_p = jax.random.split(key)
    x = jax.random.normal(k_x, (N, C_IN), jnp.float32)   # per-point features
    params = init_params(k_p, C_IN, FEAT_C, NUM_CLASSES)

    fwd = jax.jit(functools.partial(net3dseg_forward, tile_n=16384))
    preds, out_feat, out_aux = fwd(x, params)
    jax.block_until_ready((preds, out_feat, out_aux))

    # Correctness check vs pure-JAX f32 reference (bf16 compute/outputs -> looser tol).
    seg_ref, feat_ref, seg_pt_ref = reference_forward(x, params)
    assert jnp.allclose(preds["seg_logit"].astype(jnp.float32), seg_ref,
                        atol=3e-2, rtol=3e-2)
    assert jnp.allclose(out_feat.astype(jnp.float32), feat_ref,
                        atol=3e-2, rtol=3e-2)
    assert jnp.allclose(out_aux["seg_logit_point"].astype(jnp.float32), seg_pt_ref,
                        atol=3e-2, rtol=3e-2)
    assert jnp.allclose(out_aux["feats"], out_feat)
    assert preds["seg_logit"].shape == (N, NUM_CLASSES)
    assert out_aux["seg_logit_point"].shape == (N, NUM_CLASSES)
    assert out_feat.shape == (N, FEAT_C)

    print("KERNEL_OK")
</pallas_src>

<mosaic_0001>
module attributes {stable_mosaic.version = 11 : i64} {
  func.func @_net3dseg_kernel(%arg0: i32, %arg1: memref<4x384xbf16, #tpu.memory_space<vmem>>, %arg2: memref<32x4xbf16, #tpu.memory_space<vmem>>, %arg3: memref<32x1xf32, #tpu.memory_space<vmem>>, %arg4: memref<32x384xbf16, #tpu.memory_space<vmem>>) attributes {dimension_semantics = [#tpu.dimension_semantics<parallel>], iteration_bounds = array<i64: 1>, scalar_prefetch = 0 : i64, scratch_operands = 0 : i64, tpu.core_type = #tpu.core_type<tc>, window_params = [{transform_indices = @transform_0, window_bounds = array<i64: 4, 384>}, {pipeline_mode = #tpu.pipeline_mode<synchronous>, transform_indices = @transform_1, window_bounds = array<i64: 32, 4>}, {pipeline_mode = #tpu.pipeline_mode<synchronous>, transform_indices = @transform_2, window_bounds = array<i64: 32, 1>}, {transform_indices = @transform_3, window_bounds = array<i64: 32, 384>}]} {
    %c0 = arith.constant 0 : index
    %c0_0 = arith.constant 0 : index
    %0 = vector.load %arg2[%c0, %c0_0] : memref<32x4xbf16, #tpu.memory_space<vmem>>, vector<32x4xbf16>
    %c0_1 = arith.constant 0 : index
    %c0_2 = arith.constant 0 : index
    %1 = vector.load %arg1[%c0_1, %c0_2] : memref<4x384xbf16, #tpu.memory_space<vmem>>, vector<4x384xbf16>
    %cst = arith.constant dense<0.000000e+00> : vector<32x384xf32>
    %2 = tpu.matmul %0, %1, %cst {dimension_numbers = #tpu.dot_dimension_numbers<[1], [0], [0], [1], [0, 0, 1, 1], [], []>} : vector<32x4xbf16>, vector<4x384xbf16>, vector<32x384xf32> -> vector<32x384xf32>
    %c0_3 = arith.constant 0 : index
    %c0_4 = arith.constant 0 : index
    %3 = vector.load %arg3[%c0_3, %c0_4] : memref<32x1xf32, #tpu.memory_space<vmem>>, vector<32x1xf32>
    %4 = vector.broadcast %3 : vector<32x1xf32> to vector<32x384xf32>
    %5 = arith.addf %2, %4 : vector<32x384xf32>
    %6 = arith.truncf %5 : vector<32x384xf32> to vector<32x384xbf16>
    %c0_5 = arith.constant 0 : index
    %c0_6 = arith.constant 0 : index
    %7 = vector.load %arg4[%c0_5, %c0_6] : memref<32x384xbf16, #tpu.memory_space<vmem>>, vector<32x384xbf16>
    tpu.vector_store %arg4[%c0_5, %c0_6], %6 {strides = array<i32>} : memref<32x384xbf16, #tpu.memory_space<vmem>>, vector<32x384xbf16>,
    return
  }
  func.func @transform_0(%arg0: i32) -> (i32, i32) {
    %c0_i32 = arith.constant 0 : i32
    %c0_i32_0 = arith.constant 0 : i32
    return %c0_i32, %arg0 : i32, i32
  }
  func.func @transform_1(%arg0: i32) -> (i32, i32) {
    %c0_i32 = arith.constant 0 : i32
    %c0_i32_0 = arith.constant 0 : i32
    %c0_i32_1 = arith.constant 0 : i32
    return %c0_i32, %c0_i32_0 : i32, i32
  }
  func.func @transform_2(%arg0: i32) -> (i32, i32) {
    %c0_i32 = arith.constant 0 : i32
    %c0_i32_0 = arith.constant 0 : i32
    %c0_i32_1 = arith.constant 0 : i32
    return %c0_i32, %c0_i32_0 : i32, i32
  }
  func.func @transform_3(%arg0: i32) -> (i32, i32) {
    %c0_i32 = arith.constant 0 : i32
    %c0_i32_0 = arith.constant 0 : i32
    return %c0_i32, %arg0 : i32, i32
  }
}

</mosaic_0001>

<bundles_post_ra>
// kernel: net3dseg_forward.1
= control target key start
LH: loop header
LB: loop body
LE: loop exit
PB: predicated region body
PF: predicated region fallthrough
CT: control target
= control target key end

     0   :  { %v59_v0 = vlaneseq  ;;  %v282_v1 = vmov 1983009808   ;;  %v283_v3 = vmov 0   ;;  %vm71_vm0 = vcmask 31744   ;;  %s353_s0 = inlined_call_operand.vmem [shape: bf16[4,384], index: 0, kind: input, shape index: {}]   ;;  %s354_s1 = inlined_call_operand.vmem [shape: bf16[32,4], index: 1, kind: input, shape index: {}]   ;;  %s355_s2 = inlined_call_operand.vmem [shape: f32[32,1], index: 2, kind: input, shape index: {}]   ;;  %s356_s3 = inlined_call_operand.vmem [shape: bf16[32,384], index: 3, kind: output, shape index: {}]  }
   0x1   :  { %v57_v2 = vunpack.c.l.s4 %v282_v1  ;;  %120 = vmatprep.mubr.bf16.mxu0 %v283_v3  ;;  %277 = vset.pattern.permute.xlu0 %v283_v3  ;;  %v19_v4 = vld [vmem:[%s353_s0] sm:$0x3f]  ;;  %v22_v10 = vld [vmem:[%s355_s2 + $0x10] sm:$0xff]  ;;  %v21_v12 = vld [vmem:[%s355_s2 + $0x8] sm:$0xff]  ;;  %vm78_vm1 = vcmask 1041408  }
   0x2   :  { %v60_v5 = vshrl.u32 %v59_v0, 7  ;;  %v279_v6 = vld [vmem:[%s354_s1] sm:$0xff]   ;;  %278 = vset.pattern.permute.xlu1 %v283_v3  ;;  %v55_v8 = vcombine.high %v19_v4, %v19_v4  ;;  %v23_v13 = vld [vmem:[%s355_s2 + $0x18] sm:$0xff]  ;;  %v281_v19 = vld [vmem:[%s354_s1 + $0x8] sm:$0xff]  }
   0x3   :  { %v58_v7 = vunpack.c.0.s8 %v57_v2  ;;  %v20_v9 = vld [vmem:[%s355_s2] sm:$0xff]  ;;  %270 = vmatprep.mubr.msk.bf16.mxu1 %vm71_vm0, %v279_v6  ;;  %36 = vperm.xlu1 %278, %v22_v10  }
   0x4   :  { %26 = vperm.xlu0 %277, %v20_v9  }
   0x5   :  { %v61_v11 = vsub.s32 %v58_v7, %v60_v5 }
   0x7   :  { %v62_v14 = vrot.slane %v19_v4, %v61_v11  ;;  %v69_v15 = vrot.slane %v55_v8, %v61_v11  ;;  %41 = vperm.xlu1 %278, %v23_v13  }
   0x8   :  { %31 = vperm.xlu0 %277, %v21_v12  }
   0x9   :  { %v70_v16 = vcombine.high %v62_v14, %v62_v14  ;;  %v80_v17 = vsel %vm78_vm1, %v62_v14, 0  ;;  %274 = vmatprep.subr.msk.bf16.mxu1 %vm78_vm1, %v69_v15  ;;  %v86_v18 = vsel %vm78_vm1, %v69_v15, 0 }
   0xa   :  { %269 = vmatpush3.bf16.msra.mxu1 %v86_v18 }
   0xb   :  { %244 = vmatprep.subr.msk.bf16.mxu0 %vm78_vm1, %v70_v16 }
   0xc   :  { %89 = vmatpush1.bf16.msra.mxu0 %v80_v17 }
   0xd   :  { %271 = vmatmul.mubr.msk.bf16.vlgmr.msra.gmra.mrb[0].mxu1 %vm71_vm0, %v281_v19 }
   0xf   :  { %245 = vmatmul.mubr.msk.bf16.vlgmr.msra.gmra.mrb[0].mxu0 %vm71_vm0, %v279_v6 }
  0x10   :  { %130 = vmatprep.mubr.bf16.mxu0 %v283_v3 }
  0x17   :  { %246 = vmatmul.mubr.msk.bf16.gmra.mrb[4].mxu0 %vm71_vm0, %v281_v19 }
  0x82   :  { %v37_v20 = vpop.permute.xlu1 %36 }
  0x83   :  { %v27_v21 = vpop.permute.xlu0 %26 }
  0x86   :  { %v42_v23 = vpop.permute.xlu1 %41 }
  0x87   :  { %v32_v24 = vpop.permute.xlu0 %31 }
  0xe0   :  { %v272_v22 = vpop.f32.mrb[0].mxu1 }
  0xe1   :  { %v184_v25 = vadd.f32 %v272_v22, %v37_v20  ;;  %v175_v26 = vpop.f32.mrb[1].mxu1 }
  0xe2   :  { %v122_v27 = vpop.f32.mrb[0].mxu0  ;;  %v176_v28 = vadd.f32 %v175_v26, %v27_v21  ;;  %v273_v29 = vpop.f32.mrb[2].mxu1 }
  0xe3   :  { %v123_v30 = vadd.f32 %v122_v27, %v27_v21  ;;  %v124_v31 = vpop.f32.mrb[1].mxu0  ;;  %v262_v32 = vpack.c.bf16 %v184_v25, %v184_v25  ;;  %v187_v33 = vadd.f32 %v273_v29, %v42_v23  ;;  %v178_v34 = vpop.f32.mrb[3].mxu1 }
  0xe4   :  { %v125_v35 = vadd.f32 %v124_v31, %v27_v21  ;;  %v126_v36 = vpop.f32.mrb[2].mxu0  ;;  %v258_v37 = vpack.c.bf16 %v176_v28, %v176_v28  ;;  %v179_v38 = vadd.f32 %v178_v34, %v32_v24 }
  0xe5   :  { %v127_v39 = vadd.f32 %v126_v36, %v32_v24  ;;  %v128_v40 = vpop.f32.mrb[3].mxu0  ;;  %235 = vst [vmem:[%s356_s3 + $0x20] sm:$0xf] %v262_v32  ;;  %v264_v41 = vpack.c.bf16 %v187_v33, %v187_v33 }
  0xe6   :  { %v257_v42 = vpack.c.bf16 %v125_v35, %v123_v30  ;;  %v129_v43 = vadd.f32 %v128_v40, %v32_v24  ;;  %231 = vst [vmem:[%s356_s3 + $0x8] sm:$0xf] %v258_v37  ;;  %v260_v44 = vpack.c.bf16 %v179_v38, %v179_v38 }
  0xe7   :  { %237 = vst [vmem:[%s356_s3 + $0x2c] sm:$0xf] %v264_v41 }
  0xe8   :  { %230 = vst [vmem:[%s356_s3] sm:$0xff] %v257_v42  ;;  %v259_v45 = vpack.c.bf16 %v129_v43, %v127_v39  ;;  %233 = vst [vmem:[%s356_s3 + $0x14] sm:$0xf] %v260_v44 }
  0xea   :  { %232 = vst [vmem:[%s356_s3 + $0xc] sm:$0xff] %v259_v45  ;;  %v132_v46 = vpop.f32.mrb[4].mxu0 }
  0xeb   :  { %v133_v47 = vadd.f32 %v132_v46, %v37_v20  ;;  %v134_v48 = vpop.f32.mrb[5].mxu0 }
  0xec   :  { %v135_v49 = vadd.f32 %v134_v48, %v37_v20  ;;  %v136_v50 = vpop.f32.mrb[6].mxu0 }
  0xed   :  { %v137_v51 = vadd.f32 %v136_v50, %v42_v23  ;;  %v138_v52 = vpop.f32.mrb[7].mxu0 }
  0xee   :  { %v261_v53 = vpack.c.bf16 %v135_v49, %v133_v47  ;;  %v139_v54 = vadd.f32 %v138_v52, %v42_v23 }
  0xf0   :  { %234 = vst [vmem:[%s356_s3 + $0x18] sm:$0xff] %v261_v53  ;;  %v263_v55 = vpack.c.bf16 %v139_v54, %v137_v51 }
  0xf2   :  { %236 = vst [vmem:[%s356_s3 + $0x24] sm:$0xff] %v263_v55 }

</bundles_post_ra>
